<compile_context>
chip_gen: v5e
topology: v5e:2x2
jax: 0.10.0
libtpu: 0.0.40
codegen_flags: <defaults>
</compile_context>

<pallas_src>
import functools

import jax
import jax.numpy as jnp
from jax.experimental import pallas as pl
from jax.experimental.pallas import tpu as pltpu


def _round_up(n: int, m: int) -> int:
    return (n + m - 1) // m * m


def mlp_kernel(x_ref, w1_ref, b1_ref, w2_ref, b2_ref, o_ref):
    # First linear (MXU) + f32 bias, tanh (EUP, f32), second linear (MXU) + f32 bias.
    x = x_ref[...]
    h = jnp.dot(x, w1_ref[...], preferred_element_type=jnp.float32) + b1_ref[...]
    h = jnp.tanh(h)
    # astype is a no-op for f32; it is the intentional MXU-input cast when the
    # weights are bf16 (accumulation stays f32 via preferred_element_type).
    y = jnp.dot(h.astype(w2_ref.dtype), w2_ref[...],
                preferred_element_type=jnp.float32) + b2_ref[...]
    o_ref[...] = y.astype(o_ref.dtype)


@functools.partial(jax.jit, static_argnames=("block_batch", "compute_dtype"))
def net2_forward(x, w1, b1, w2, b2, *, block_batch=4096, compute_dtype=None):
    """x: [B, num_input]; w1: [num_input, num_hidden]; b1: [1, num_hidden];
    w2: [num_hidden, num_input]; b2: [1, num_input].

    Weights are stored pre-transposed as [in, out] so the kernel computes
    plain x @ W (PyTorch Linear is x @ W^T + b)."""
    B, num_input = x.shape
    num_hidden = w1.shape[1]
    assert w1.shape == (num_input, num_hidden)
    assert b1.shape == (1, num_hidden)
    assert w2.shape == (num_hidden, num_input)
    assert b2.shape == (1, num_input)

    if compute_dtype is None:
        compute_dtype = x.dtype
    compute_dtype = jnp.dtype(compute_dtype)
    out_dtype = x.dtype

    # ---- Batch tiling -------------------------------------------------------
    # Sublane packing for the compute dtype.
    sub = 16 if compute_dtype == jnp.dtype(jnp.bfloat16) else 8
    # Never bigger than the (sublane-rounded) batch.
    bm = min(block_batch, _round_up(B, sub))
    # v7x dual-TC: keep >= 2 grid steps when the batch is large enough.
    if B >= 2 * sub:
        bm = min(bm, _round_up(-(-B // 2), sub))
    BM = _round_up(max(bm, 1), sub)
    Bp = _round_up(B, BM)
    grid = (Bp // BM,)

    # ---- Inputs (no feature padding; only minimal batch padding) ------------
    xc = x.astype(compute_dtype)
    if Bp != B:
        xc = jnp.zeros((Bp, num_input), compute_dtype).at[:B].set(xc)
    w1c = w1.astype(compute_dtype)
    w2c = w2.astype(compute_dtype)
    b1f = b1.astype(jnp.float32)
    b2f = b2.astype(jnp.float32)

    itemsize_c = compute_dtype.itemsize
    itemsize_o = jnp.dtype(out_dtype).itemsize

    # ---- Cost estimate (advisory) -------------------------------------------
    bytes_accessed = (
        Bp * num_input * itemsize_c                      # x
        + (w1c.size + w2c.size) * itemsize_c             # weights
        + (b1f.size + b2f.size) * 4                      # biases
        + Bp * num_input * itemsize_o                    # out
    )
    cost = pl.CostEstimate(
        flops=2 * Bp * num_input * num_hidden * 2,       # two matmuls, same size
        transcendentals=Bp * num_hidden,
        bytes_accessed=bytes_accessed,
    )

    # ---- VMEM limit: double-buffered tiles + resident weights + slack -------
    act_bytes = BM * num_input * (itemsize_c + itemsize_o)
    wgt_bytes = (w1c.size + w2c.size) * itemsize_c + (b1f.size + b2f.size) * 4
    vmem_limit_bytes = int(
        min(max(4 * (act_bytes + wgt_bytes) + (4 << 20), 32 << 20), 60 << 20))

    out = pl.pallas_call(
        mlp_kernel,
        out_shape=jax.ShapeDtypeStruct((Bp, num_input), out_dtype),
        grid_spec=pltpu.PrefetchScalarGridSpec(
            num_scalar_prefetch=0,
            grid=grid,
            in_specs=[
                # Batch-tiled activations: pipelined / double-buffered.
                pl.BlockSpec((BM, num_input), lambda i: (i, 0)),
                # Weights & biases: constant index_map -> fetched once,
                # VMEM-resident across all grid steps (full-array blocks).
                pl.BlockSpec((num_input, num_hidden), lambda i: (0, 0)),
                pl.BlockSpec((1, num_hidden), lambda i: (0, 0)),
                pl.BlockSpec((num_hidden, num_input), lambda i: (0, 0)),
                pl.BlockSpec((1, num_input), lambda i: (0, 0)),
            ],
            out_specs=pl.BlockSpec((BM, num_input), lambda i: (i, 0)),
        ),
        compiler_params=pltpu.CompilerParams(
            dimension_semantics=("parallel",),
            vmem_limit_bytes=vmem_limit_bytes,
        ),
        cost_estimate=cost,
    )(xc, w1c, b1f, w2c, b2f)

    if Bp != B:
        out = out[:B]
    return out


def init_params(key, num_input, num_hidden):
    """Deterministic init matching nn.Linear's U(-1/sqrt(fan_in), 1/sqrt(fan_in))."""
    k1, k2, k3, k4 = jax.random.split(key, 4)
    bound1 = 1.0 / jnp.sqrt(num_input)
    bound2 = 1.0 / jnp.sqrt(num_hidden)
    # Stored as [in, out] (transpose of PyTorch's [out, in] weight layout).
    w1 = jax.random.uniform(k1, (num_input, num_hidden), jnp.float32, -bound1, bound1)
    b1 = jax.random.uniform(k2, (1, num_hidden), jnp.float32, -bound1, bound1)
    w2 = jax.random.uniform(k3, (num_hidden, num_input), jnp.float32, -bound2, bound2)
    b2 = jax.random.uniform(k4, (1, num_input), jnp.float32, -bound2, bound2)
    return w1, b1, w2, b2


if __name__ == "__main__":
    num_input, num_hidden, num_output = 32, 64, 16  # num_output unused by forward()

    key = jax.random.PRNGKey(0)
    kx, kp, kx2 = jax.random.split(key, 3)
    w1, b1, w2, b2 = init_params(kp, num_input, num_hidden)

    # Small demo shape (matches the original module's intended use).
    batch = 8
    x = jax.random.normal(kx, (batch, num_input), jnp.float32)
    out = net2_forward(x, w1, b1, w2, b2)
    jax.block_until_ready(out)
    ref = jnp.tanh(x @ w1 + b1) @ w2 + b2
    assert out.shape == (batch, num_input)
    assert jnp.allclose(out, ref, atol=1e-5, rtol=1e-5)

    # Larger, non-multiple batch to exercise the multi-step grid + batch padding.
    batch2 = 300
    x2 = jax.random.normal(kx2, (batch2, num_input), jnp.float32)
    out2 = net2_forward(x2, w1, b1, w2, b2, block_batch=128)
    jax.block_until_ready(out2)
    ref2 = jnp.tanh(x2 @ w1 + b1) @ w2 + b2
    assert out2.shape == (batch2, num_input)
    assert jnp.allclose(out2, ref2, atol=1e-5, rtol=1e-5)

    print("KERNEL_OK")
</pallas_src>

<mosaic_0001>
module attributes {stable_mosaic.version = 11 : i64} {
  func.func @mlp_kernel(%arg0: i32, %arg1: memref<8x32xf32, #tpu.memory_space<vmem>>, %arg2: memref<32x64xf32, #tpu.memory_space<vmem>>, %arg3: memref<1x64xf32, #tpu.memory_space<vmem>>, %arg4: memref<64x32xf32, #tpu.memory_space<vmem>>, %arg5: memref<1x32xf32, #tpu.memory_space<vmem>>, %arg6: memref<8x32xf32, #tpu.memory_space<vmem>>) attributes {dimension_semantics = [#tpu.dimension_semantics<parallel>], iteration_bounds = array<i64: 1>, scalar_prefetch = 0 : i64, scratch_operands = 0 : i64, tpu.core_type = #tpu.core_type<tc>, window_params = [{transform_indices = @transform_0, window_bounds = array<i64: 8, 32>}, {pipeline_mode = #tpu.pipeline_mode<synchronous>, transform_indices = @transform_1, window_bounds = array<i64: 32, 64>}, {pipeline_mode = #tpu.pipeline_mode<synchronous>, transform_indices = @transform_2, window_bounds = array<i64: 1, 64>}, {pipeline_mode = #tpu.pipeline_mode<synchronous>, transform_indices = @transform_3, window_bounds = array<i64: 64, 32>}, {pipeline_mode = #tpu.pipeline_mode<synchronous>, transform_indices = @transform_4, window_bounds = array<i64: 1, 32>}, {transform_indices = @transform_5, window_bounds = array<i64: 8, 32>}]} {
    %c0 = arith.constant 0 : index
    %c0_0 = arith.constant 0 : index
    %0 = vector.load %arg1[%c0, %c0_0] : memref<8x32xf32, #tpu.memory_space<vmem>>, vector<8x32xf32>
    %c0_1 = arith.constant 0 : index
    %c0_2 = arith.constant 0 : index
    %1 = vector.load %arg2[%c0_1, %c0_2] : memref<32x64xf32, #tpu.memory_space<vmem>>, vector<32x64xf32>
    %cst = arith.constant dense<0.000000e+00> : vector<8x64xf32>
    %2 = tpu.matmul %0, %1, %cst {dimension_numbers = #tpu.dot_dimension_numbers<[1], [0], [0], [1], [0, 0, 1, 1], [], []>} : vector<8x32xf32>, vector<32x64xf32>, vector<8x64xf32> -> vector<8x64xf32>
    %c0_3 = arith.constant 0 : index
    %c0_4 = arith.constant 0 : index
    %3 = vector.load %arg3[%c0_3, %c0_4] : memref<1x64xf32, #tpu.memory_space<vmem>>, vector<1x64xf32>
    %4 = vector.broadcast %3 : vector<1x64xf32> to vector<8x64xf32>
    %5 = arith.addf %2, %4 : vector<8x64xf32>
    %6 = math.tanh %5 : vector<8x64xf32>
    %c0_5 = arith.constant 0 : index
    %c0_6 = arith.constant 0 : index
    %7 = vector.load %arg4[%c0_5, %c0_6] : memref<64x32xf32, #tpu.memory_space<vmem>>, vector<64x32xf32>
    %cst_7 = arith.constant dense<0.000000e+00> : vector<8x32xf32>
    %8 = tpu.matmul %6, %7, %cst_7 {dimension_numbers = #tpu.dot_dimension_numbers<[1], [0], [0], [1], [0, 0, 1, 1], [], []>} : vector<8x64xf32>, vector<64x32xf32>, vector<8x32xf32> -> vector<8x32xf32>
    %c0_8 = arith.constant 0 : index
    %c0_9 = arith.constant 0 : index
    %9 = vector.load %arg5[%c0_8, %c0_9] : memref<1x32xf32, #tpu.memory_space<vmem>>, vector<1x32xf32>
    %10 = vector.broadcast %9 : vector<1x32xf32> to vector<8x32xf32>
    %11 = arith.addf %8, %10 : vector<8x32xf32>
    %c0_10 = arith.constant 0 : index
    %c0_11 = arith.constant 0 : index
    %12 = vector.load %arg6[%c0_10, %c0_11] : memref<8x32xf32, #tpu.memory_space<vmem>>, vector<8x32xf32>
    tpu.vector_store %arg6[%c0_10, %c0_11], %11 {strides = array<i32>} : memref<8x32xf32, #tpu.memory_space<vmem>>, vector<8x32xf32>,
    return
  }
  func.func @transform_0(%arg0: i32) -> (i32, i32) {
    %c0_i32 = arith.constant 0 : i32
    %c0_i32_0 = arith.constant 0 : i32
    return %arg0, %c0_i32 : i32, i32
  }
  func.func @transform_1(%arg0: i32) -> (i32, i32) {
    %c0_i32 = arith.constant 0 : i32
    %c0_i32_0 = arith.constant 0 : i32
    %c0_i32_1 = arith.constant 0 : i32
    return %c0_i32, %c0_i32_0 : i32, i32
  }
  func.func @transform_2(%arg0: i32) -> (i32, i32) {
    %c0_i32 = arith.constant 0 : i32
    %c0_i32_0 = arith.constant 0 : i32
    %c0_i32_1 = arith.constant 0 : i32
    return %c0_i32, %c0_i32_0 : i32, i32
  }
  func.func @transform_3(%arg0: i32) -> (i32, i32) {
    %c0_i32 = arith.constant 0 : i32
    %c0_i32_0 = arith.constant 0 : i32
    %c0_i32_1 = arith.constant 0 : i32
    return %c0_i32, %c0_i32_0 : i32, i32
  }
  func.func @transform_4(%arg0: i32) -> (i32, i32) {
    %c0_i32 = arith.constant 0 : i32
    %c0_i32_0 = arith.constant 0 : i32
    %c0_i32_1 = arith.constant 0 : i32
    return %c0_i32, %c0_i32_0 : i32, i32
  }
  func.func @transform_5(%arg0: i32) -> (i32, i32) {
    %c0_i32 = arith.constant 0 : i32
    %c0_i32_0 = arith.constant 0 : i32
    return %arg0, %c0_i32 : i32, i32
  }
}

</mosaic_0001>

<bundles_post_ra>
// kernel: net2_forward.1
= control target key start
LH: loop header
LB: loop body
LE: loop exit
PB: predicated region body
PF: predicated region fallthrough
CT: control target
= control target key end

     0   :  { %s222_s0 = inlined_call_operand.vmem [shape: f32[8,32], index: 0, kind: input, shape index: {}]   ;;  %s223_s1 = inlined_call_operand.vmem [shape: f32[32,64], index: 1, kind: input, shape index: {}]   ;;  %s224_s2 = inlined_call_operand.vmem [shape: f32[1,64], index: 2, kind: input, shape index: {}]   ;;  %s225_s3 = inlined_call_operand.vmem [shape: f32[64,32], index: 3, kind: input, shape index: {}]   ;;  %s226_s4 = inlined_call_operand.vmem [shape: f32[1,32], index: 4, kind: input, shape index: {}]   ;;  %s227_s5 = inlined_call_operand.hbm [shape: f32[8,32], index: 5, kind: output, shape index: {}]  }
   0x1   :  { %v25_v0 = vld [vmem:[%s223_s1 + $0x18] sm:$0xff]  ;;  %v24_v1 = vld [vmem:[%s223_s1 + $0x10] sm:$0xff]  ;;  %v23_v3 = vld [vmem:[%s223_s1 + $0x8] sm:$0xff] }
   0x2   :  { %46 = vmatpush.msra.mxu0 %v25_v0  ;;  %v62_v2 = vld [vmem:[%s225_s3 + $0x38] sm:$0xff]  ;;  %v61_v4 = vld [vmem:[%s225_s3 + $0x30] sm:$0xff]  ;;  %v60_v5 = vld [vmem:[%s225_s3 + $0x28] sm:$0xff] }
   0x3   :  { %79 = vmatpush.msra.mxu1 %v62_v2 }
   0x4   :  { %47 = vmatpush.msra.mxu0 %v24_v1 }
   0x5   :  { %10 = vsyncpa [#allocation3], 0  ;;  %v22_v6 = vld [vmem:[%s223_s1] sm:$0xff]  ;;  %80 = vmatpush.msra.mxu1 %v61_v4  ;;  %vm30_vm0 = vcmask 261120   ;;  %v58_v9 = vld [vmem:[%s225_s3 + $0x18] sm:$0xff]  ;;  %vm67_vm1 = vcmask 523264  }
   0x6   :  { %48 = vmatpush.msra.mxu0 %v23_v3  ;;  %v21_v7 = vld [vmem:[%s222_s0] sm:$0xff]  ;;  %v57_v10 = vld [vmem:[%s225_s3 + $0x10] sm:$0xff]  ;;  %v56_v11 = vld [vmem:[%s225_s3 + $0x8] sm:$0xff]  ;;  %s141_s21 = smov [#allocation2]   ;;  %s99_s24 = sshll.u32 %s227_s5, 4  ;;  %s100_s24 = int_to_ptr.hbm [resolvable:$true] %s99_s24 }
   0x7   :  { %81 = vmatpush.msra.mxu1 %v60_v5  ;;  %v59_v8 = vld [vmem:[%s225_s3 + $0x20] sm:$0xff]  ;;  %s97_s22 = sshll.u32 %s141_s21, 4  ;;  %s98_s22 = int_to_ptr.vmem [resolvable:$true] %s97_s22 }
   0x8   :  { %49 = vmatpush.msra.mxu0 %v22_v6  ;;  %v55_v12 = vld [vmem:[%s225_s3] sm:$0xff] }
   0x9   :  { %108 = vmatmul.msk.f32.vlgmr.msra.gmra.mxu0 %vm30_vm0, %v21_v7  ;;  %82 = vmatpush.msra.mxu1 %v59_v8  ;;  %v111_v13 = vld [vmem:[%s224_s2] ss:$0 sm:$0xff] }
   0xa   :  { %v112_v17 = vld [vmem:[%s226_s4] ss:$0 sm:$0xff] }
   0xb   :  { %83 = vmatpush.msra.mxu1 %v58_v9 }
   0xd   :  { %84 = vmatpush.msra.mxu1 %v57_v10 }
   0xf   :  { %85 = vmatpush.msra.mxu1 %v56_v11 }
  0x11   :  { %86 = vmatpush.msra.mxu1 %v55_v12 }
  0x86   :  { %v51_v14 = vpop.f32.mrf.mxu0 }
  0x87   :  { %v52_v15 = vadd.f32 %v111_v13, %v51_v14 }
  0x89   :  { %113 = vtanh.f32 %v52_v15 }
  0x8f   :  { %v114_v16 = vpop.eup %113 }
  0x90   :  { %109 = vmatmul.msk.f32.vlgmr.msra.gmra.mxu1 %vm67_vm1, %v114_v16 }
 0x10d   :  { %v88_v18 = vpop.f32.mrf.mxu1 }
 0x10e   :  { %v89_v19 = vadd.f32 %v112_v17, %v88_v18 }
 0x110   :  { %91 = vst.msk [vmem:[#allocation2] sm:$0xff] %vm30_vm0, %v89_v19 }
 0x111   :  { %102 = dma.vmem_to_hbm [thread:$0]  %s98_s22, 128, %s100_s24, [#allocation3]  }
 0x112   :  { %139 = dma.done.wait [#allocation3], 128  }
 0x113   :  { %140 = vsyncadd [#allocation3], 4294967168 }
 0x114   :  { %107 = vsyncpa [#allocation3], 1 }

</bundles_post_ra>
